<compile_context>
chip_gen: v5e
topology: v5e:2x2
jax: 0.10.0
libtpu: 0.0.40
codegen_flags: <defaults>
</compile_context>

<pallas_src>
import math
from functools import partial

import jax
import jax.numpy as jnp
import numpy as np
from jax.experimental import pallas as pl
from jax.experimental.pallas import tpu as pltpu


def _round_up(x, m):
    return (x + m - 1) // m * m


def _pad_frac(dim, tile):
    return (_round_up(dim, tile) - dim) / max(dim, 1)


def _pad2d(a, rows, cols, dtype):
    r, c = a.shape
    a = a.astype(dtype)
    if r == rows and c == cols:
        return a
    return jnp.pad(a, ((0, rows - r), (0, cols - c)))


def _tpu_generation():
    """Best-effort TPU generation (4/5/6/7) from device_kind; None if unknown."""
    try:
        kind = jax.devices()[0].device_kind.lower()
    except Exception:
        return None
    for g in (7, 6, 5, 4):
        if f"v{g}" in kind or f"tpu{g}" in kind:
            return g
    return None


def _pick_mm_tiles(m, k, n_out_p, itemsize, budget, *, row_cap, col_cap):
    """Pick power-of-two (tm, tk) for a tiled [m,k] @ [k,n_out_p] matmul.

    Budgets the double-buffered A/B streams + pipelined output tile + f32
    accumulator against `budget` bytes, and rejects tiles that would pad the
    logical dims by more than ~15% (keeps the zero-padded copies small).
    """
    def fits(tm, tk):
        need = (2 * tm * tk * itemsize            # A, double buffered
                + 2 * tk * n_out_p * itemsize     # B, double buffered
                + 2 * tm * n_out_p * 4            # output tile (pipelined)
                + tm * n_out_p * 4                # f32 accumulator scratch
                + 2 * n_out_p * 4)                # bias
        return need <= budget

    tm = 128
    for cand in (1024, 512, 256, 128):
        if cand <= row_cap and _pad_frac(m, cand) <= 0.15 and fits(cand, 128):
            tm = cand
            break
    tk = 128
    for cand in (1024, 512, 256, 128):
        if cand <= col_cap and _pad_frac(k, cand) <= 0.15 and fits(tm, cand):
            tk = cand
            break
    return tm, tk


def _make_mm_kernel(has_bias):
    """Tiled matmul body: f32 accumulator, init at k==0, finalize at last k."""
    def kernel(*refs):
        if has_bias:
            a_ref, b_ref, bias_ref, o_ref, acc_ref = refs
        else:
            a_ref, b_ref, o_ref, acc_ref = refs
            bias_ref = None

        kk = pl.program_id(1)

        @pl.when(kk == 0)
        def _init():
            acc_ref[...] = jnp.zeros_like(acc_ref)

        acc_ref[...] += jnp.dot(a_ref[...], b_ref[...],
                                preferred_element_type=jnp.float32)

        @pl.when(kk == pl.num_programs(1) - 1)
        def _finalize():
            out = acc_ref[...]
            if has_bias:
                out = out + bias_ref[...]          # f32 epilogue (v5e: no bf16 VPU)
            o_ref[...] = out.astype(o_ref.dtype)

    return kernel


def _matmul_pallas(a, b, bias, *, tm, tk, out_dtype, vmem_limit):
    """out = a @ b (+ bias).  a:[M,K], b:[K,Nout], bias:[1,Nout] f32 or None.

    Wrapper guarantees M % tm == 0, K % tk == 0, Nout % 128 == 0 (lane-dense
    output -> unmasked vst).  Grid = (row tiles [parallel], reduction tiles
    [arbitrary]); reduction axis last, f32 VMEM accumulator.
    """
    m, k = a.shape
    k2, n_out = b.shape
    assert k == k2 and m % tm == 0 and k % tk == 0 and n_out % 128 == 0

    has_bias = bias is not None
    in_specs = [
        pl.BlockSpec((tm, tk), lambda i, kk: (i, kk)),      # A tile (streamed)
        pl.BlockSpec((tk, n_out), lambda i, kk: (kk, 0)),   # B tile (streamed over k)
    ]
    args = [a, b]
    if has_bias:
        # Constant-index spec; (1, Nout) f32 is tiny so buffering cost is ~0.
        in_specs.append(pl.BlockSpec((1, n_out), lambda i, kk: (0, 0)))
        args.append(bias)

    return pl.pallas_call(
        _make_mm_kernel(has_bias),
        out_shape=jax.ShapeDtypeStruct((m, n_out), out_dtype),
        grid_spec=pltpu.PrefetchScalarGridSpec(
            num_scalar_prefetch=0,
            grid=(m // tm, k // tk),
            in_specs=in_specs,
            out_specs=pl.BlockSpec((tm, n_out), lambda i, kk: (i, 0)),
            scratch_shapes=[pltpu.VMEM((tm, n_out), jnp.float32)],
        ),
        compiler_params=pltpu.CompilerParams(
            dimension_semantics=("parallel", "arbitrary"),
            vmem_limit_bytes=vmem_limit,
        ),
    )(*args)


def gcn_forward(x, adj, weight, bias=None, *, compute_dtype=jnp.bfloat16):
    """Pallas GraphConvolution forward: adj @ (x @ W) (+ bias), FLOP-optimal order.

    x:      [N, F_in]
    adj:    [N, N] dense normalized adjacency
    weight: [F_in, F_out]
    bias:   [F_out] or None
    compute_dtype: dtype streamed to the MXU.  bf16 (default) halves the HBM
        traffic of this mem-bound kernel on every generation; f32 is exact.
        Accumulation is always f32; the bias epilogue is f32.
    returns [N, F_out] float32
    """
    n, f_in = x.shape
    f_in_w, f_out = weight.shape
    assert f_in == f_in_w, "weight shape mismatch"
    assert adj.shape == (n, n), "adj must be [N, N]"

    f_out_p = _round_up(f_out, 128)
    f_in_lane = _round_up(f_in, 128)
    xw_first = f_out_p <= f_in_lane          # FLOP-optimal contraction order

    gen = _tpu_generation()
    is_v7x = (gen == 7)
    # v5e/v6e: 128 MiB physical VMEM -> 80 MiB scoped limit and bigger tiles.
    # v7x (or unknown): 64 MiB physical -> stay <= 48 MiB.
    if gen in (5, 6):
        vmem_limit = 80 * 1024 * 1024
    elif gen == 4:
        vmem_limit = 64 * 1024 * 1024
    else:
        vmem_limit = 48 * 1024 * 1024
    budget = int(vmem_limit * 0.70)          # headroom for compiler temporaries
    isz = jnp.dtype(compute_dtype).itemsize

    # Row-tile cap: on v7x keep >=2 (ideally many) row tiles so the "parallel"
    # axis feeds both TensorCores; v5e/v6e take up to 512-row tiles.
    row_cap = (128 if n <= 1024 else 512) if is_v7x else 512
    col_cap = 1024

    bias_p = None
    if bias is not None:
        bias_p = _pad2d(bias.astype(jnp.float32).reshape(1, f_out),
                        1, f_out_p, jnp.float32)

    if xw_first:
        # ---- Stage 2 (dominant, adj-stream bound): out = adj @ support (+bias).
        tm2, tk2 = _pick_mm_tiles(n, n, f_out_p, isz, budget,
                                  row_cap=row_cap, col_cap=col_cap)
        n_p = _round_up(n, max(tm2, tk2))     # power-of-two tiles: both divide n_p

        # ---- Stage 1 (computed exactly ONCE): support = x @ W, stored
        # lane-dense in compute_dtype so stage 2 streams (tk2, F_out_p) tiles.
        tm1, tk1 = _pick_mm_tiles(n, f_in, f_out_p, isz, budget,
                                  row_cap=max(tm2, tk2), col_cap=col_cap)
        f_in_p = _round_up(f_in, tk1)

        x_p = _pad2d(x, n_p, f_in_p, compute_dtype)
        w_p = _pad2d(weight, f_in_p, f_out_p, compute_dtype)
        adj_p = _pad2d(adj, n_p, n_p, compute_dtype)

        support = _matmul_pallas(x_p, w_p, None, tm=tm1, tk=tk1,
                                 out_dtype=compute_dtype, vmem_limit=vmem_limit)
        out_p = _matmul_pallas(adj_p, support, bias_p, tm=tm2, tk=tk2,
                               out_dtype=jnp.float32, vmem_limit=vmem_limit)
    else:
        # F_out > F_in: (adj @ x) @ W is fewer FLOPs / smaller intermediate.
        f_in_p = f_in_lane
        tm1, tk1 = _pick_mm_tiles(n, n, f_in_p, isz, budget,
                                  row_cap=row_cap, col_cap=col_cap)
        n_p = _round_up(n, max(tm1, tk1))

        adj_p = _pad2d(adj, n_p, n_p, compute_dtype)
        x_p = _pad2d(x, n_p, f_in_p, compute_dtype)

        # Keep the aggregated intermediate and W in f32 so the f32 accumulator
        # is never downcast before the final matmul (F_in is small here).
        t = _matmul_pallas(adj_p, x_p, None, tm=tm1, tk=tk1,
                           out_dtype=jnp.float32, vmem_limit=vmem_limit)

        w_p = _pad2d(weight, f_in_p, f_out_p, jnp.float32)
        tk2 = max(c for c in (512, 256, 128) if f_in_p % c == 0)
        tm2 = max(tm1, tk1)                  # divides n_p by construction
        while tm2 > 128 and (2 * tm2 * tk2 * 4 + 2 * tk2 * f_out_p * 4
                             + 3 * tm2 * f_out_p * 4) > budget:
            tm2 //= 2
        out_p = _matmul_pallas(t, w_p, bias_p, tm=tm2, tk=tk2,
                               out_dtype=jnp.float32, vmem_limit=vmem_limit)

    return out_p[:n, :f_out]


def init_gcn_params(key, in_features, out_features, bias=True):
    """Deterministic re-implementation of GraphConvolution.reset_parameters."""
    stdv = 1.0 / math.sqrt(out_features)
    kw, kb = jax.random.split(key)
    weight = jax.random.uniform(kw, (in_features, out_features),
                                minval=-stdv, maxval=stdv, dtype=jnp.float32)
    b = None
    if bias:
        b = jax.random.uniform(kb, (out_features,),
                               minval=-stdv, maxval=stdv, dtype=jnp.float32)
    return weight, b


def _ref_gcn(x, adj, weight, bias):
    r = np.asarray(adj, np.float64) @ (np.asarray(x, np.float64)
                                       @ np.asarray(weight, np.float64))
    if bias is not None:
        r = r + np.asarray(bias, np.float64)[None, :]
    return r


if __name__ == "__main__":
    # Small Cora-like problem. N=200 deliberately NOT a tile multiple so the
    # padding/slicing path is exercised.
    N, F_IN, F_OUT = 200, 96, 32

    key = jax.random.PRNGKey(0)
    k_x, k_adj, k_p1, k_p2 = jax.random.split(key, 4)

    x = jax.random.normal(k_x, (N, F_IN), dtype=jnp.float32)

    # Symmetric, row-normalized dense adjacency D^-1 (A + I).
    a_raw = (jax.random.uniform(k_adj, (N, N)) < 0.05).astype(jnp.float32)
    a_sym = jnp.clip(a_raw + a_raw.T, 0.0, 1.0) + jnp.eye(N, dtype=jnp.float32)
    adj = a_sym / jnp.sum(a_sym, axis=1, keepdims=True)

    w1, b1 = init_gcn_params(k_p1, F_IN, F_OUT, bias=True)

    # jit so the pad + dtype-cast of adj/x fuse into a single pass.
    gcn_f32 = jax.jit(partial(gcn_forward, compute_dtype=jnp.float32))
    gcn_bf16 = jax.jit(partial(gcn_forward, compute_dtype=jnp.bfloat16))

    # 1) exact f32 path, F_out <= F_in (adj @ (x@W) order), with bias.
    out1 = jax.block_until_ready(gcn_f32(x, adj, w1, b1))
    assert out1.shape == (N, F_OUT)
    assert np.allclose(np.asarray(out1), _ref_gcn(x, adj, w1, b1),
                       atol=1e-3, rtol=1e-3), "f32 path mismatch vs reference"

    # 2) default bf16 streaming / f32 accumulation (halved HBM traffic).
    out1_bf = jax.block_until_ready(gcn_bf16(x, adj, w1, b1))
    assert np.allclose(np.asarray(out1_bf), _ref_gcn(x, adj, w1, b1),
                       atol=5e-2, rtol=5e-2), "bf16 path mismatch vs reference"

    # 3) F_out > F_in triggers the (adj@x)@W order; bias=None path
    #    (no bias tile is DMA'd at all).
    F_IN2, F_OUT2 = 32, 192
    x2 = jax.random.normal(jax.random.PRNGKey(1), (N, F_IN2), dtype=jnp.float32)
    w2, _ = init_gcn_params(k_p2, F_IN2, F_OUT2, bias=False)
    out2 = jax.block_until_ready(gcn_f32(x2, adj, w2, None))
    assert out2.shape == (N, F_OUT2)
    assert np.allclose(np.asarray(out2), _ref_gcn(x2, adj, w2, None),
                       atol=1e-3, rtol=1e-3), "no-bias / AX-first path mismatch"

    print("KERNEL_OK")
</pallas_src>

<mosaic_0001>
module attributes {stable_mosaic.version = 11 : i64} {
  func.func @kernel(%arg0: i32, %arg1: i32, %arg2: memref<128x128xf32, #tpu.memory_space<vmem>>, %arg3: memref<128x128xf32, #tpu.memory_space<vmem>>, %arg4: memref<128x128xf32, #tpu.memory_space<vmem>>, %arg5: memref<128x128xf32, #tpu.memory_space<vmem>>) attributes {dimension_semantics = [#tpu.dimension_semantics<parallel>, #tpu.dimension_semantics<arbitrary>], iteration_bounds = array<i64: 2, 1>, scalar_prefetch = 0 : i64, scratch_operands = 1 : i64, tpu.core_type = #tpu.core_type<tc>, window_params = [{transform_indices = @transform_0, window_bounds = array<i64: 128, 128>}, {transform_indices = @transform_1, window_bounds = array<i64: 128, 128>}, {transform_indices = @transform_2, window_bounds = array<i64: 128, 128>}]} {
    %c0_i32 = arith.constant 0 : i32
    %0 = arith.cmpi eq, %arg1, %c0_i32 : i32
    %1 = arith.extui %0 : i1 to i32
    %c0_i32_0 = arith.constant 0 : i32
    %2 = arith.cmpi ne, %1, %c0_i32_0 : i32
    scf.if %2 {
      %cst_10 = arith.constant 0.000000e+00 : f32
      %12 = vector.broadcast %cst_10 : f32 to vector<128x128xf32>
      %c0_11 = arith.constant 0 : index
      %c0_12 = arith.constant 0 : index
      %13 = vector.load %arg5[%c0_11, %c0_12] : memref<128x128xf32, #tpu.memory_space<vmem>>, vector<128x128xf32>
      tpu.vector_store %arg5[%c0_11, %c0_12], %12 {strides = array<i32>} : memref<128x128xf32, #tpu.memory_space<vmem>>, vector<128x128xf32>,
    } else {
    }
    %c0 = arith.constant 0 : index
    %c0_1 = arith.constant 0 : index
    %3 = vector.load %arg5[%c0, %c0_1] : memref<128x128xf32, #tpu.memory_space<vmem>>, vector<128x128xf32>
    %c0_2 = arith.constant 0 : index
    %c0_3 = arith.constant 0 : index
    %4 = vector.load %arg2[%c0_2, %c0_3] : memref<128x128xf32, #tpu.memory_space<vmem>>, vector<128x128xf32>
    %c0_4 = arith.constant 0 : index
    %c0_5 = arith.constant 0 : index
    %5 = vector.load %arg3[%c0_4, %c0_5] : memref<128x128xf32, #tpu.memory_space<vmem>>, vector<128x128xf32>
    %cst = arith.constant dense<0.000000e+00> : vector<128x128xf32>
    %6 = tpu.matmul %4, %5, %cst {dimension_numbers = #tpu.dot_dimension_numbers<[1], [0], [0], [1], [0, 0, 1, 1], [], []>} : vector<128x128xf32>, vector<128x128xf32>, vector<128x128xf32> -> vector<128x128xf32>
    %7 = arith.addf %3, %6 : vector<128x128xf32>
    %c0_6 = arith.constant 0 : index
    %c0_7 = arith.constant 0 : index
    %8 = vector.load %arg5[%c0_6, %c0_7] : memref<128x128xf32, #tpu.memory_space<vmem>>, vector<128x128xf32>
    tpu.vector_store %arg5[%c0_6, %c0_7], %7 {strides = array<i32>} : memref<128x128xf32, #tpu.memory_space<vmem>>, vector<128x128xf32>,
    %c0_i32_8 = arith.constant 0 : i32
    %9 = arith.cmpi eq, %arg1, %c0_i32_8 : i32
    %10 = arith.extui %9 : i1 to i32
    %c0_i32_9 = arith.constant 0 : i32
    %11 = arith.cmpi ne, %10, %c0_i32_9 : i32
    scf.if %11 {
      %c0_10 = arith.constant 0 : index
      %c0_11 = arith.constant 0 : index
      %12 = vector.load %arg5[%c0_10, %c0_11] : memref<128x128xf32, #tpu.memory_space<vmem>>, vector<128x128xf32>
      %c0_12 = arith.constant 0 : index
      %c0_13 = arith.constant 0 : index
      %13 = vector.load %arg4[%c0_12, %c0_13] : memref<128x128xf32, #tpu.memory_space<vmem>>, vector<128x128xf32>
      tpu.vector_store %arg4[%c0_12, %c0_13], %12 {strides = array<i32>} : memref<128x128xf32, #tpu.memory_space<vmem>>, vector<128x128xf32>,
    } else {
    }
    return
  }
  func.func @transform_0(%arg0: i32, %arg1: i32) -> (i32, i32) {
    %c0_i32 = arith.constant 0 : i32
    return %arg0, %arg1 : i32, i32
  }
  func.func @transform_1(%arg0: i32, %arg1: i32) -> (i32, i32) {
    %c0_i32 = arith.constant 0 : i32
    %c0_i32_0 = arith.constant 0 : i32
    return %arg1, %c0_i32 : i32, i32
  }
  func.func @transform_2(%arg0: i32, %arg1: i32) -> (i32, i32) {
    %c0_i32 = arith.constant 0 : i32
    %c0_i32_0 = arith.constant 0 : i32
    return %arg0, %c0_i32 : i32, i32
  }
}

module attributes {stable_mosaic.version = 11 : i64} {
  func.func @kernel(%arg0: i32, %arg1: i32, %arg2: memref<128x128xf32, #tpu.memory_space<vmem>>, %arg3: memref<128x128xf32, #tpu.memory_space<vmem>>, %arg4: memref<1x128xf32, #tpu.memory_space<vmem>>, %arg5: memref<128x128xf32, #tpu.memory_space<vmem>>, %arg6: memref<128x128xf32, #tpu.memory_space<vmem>>) attributes {dimension_semantics = [#tpu.dimension_semantics<parallel>, #tpu.dimension_semantics<arbitrary>], iteration_bounds = array<i64: 2, 2>, scalar_prefetch = 0 : i64, scratch_operands = 1 : i64, tpu.core_type = #tpu.core_type<tc>, window_params = [{transform_indices = @transform_0, window_bounds = array<i64: 128, 128>}, {transform_indices = @transform_1, window_bounds = array<i64: 128, 128>}, {pipeline_mode = #tpu.pipeline_mode<synchronous>, transform_indices = @transform_2, window_bounds = array<i64: 1, 128>}, {transform_indices = @transform_3, window_bounds = array<i64: 128, 128>}]} {
    %c0_i32 = arith.constant 0 : i32
    %0 = arith.cmpi eq, %arg1, %c0_i32 : i32
    %1 = arith.extui %0 : i1 to i32
    %c0_i32_0 = arith.constant 0 : i32
    %2 = arith.cmpi ne, %1, %c0_i32_0 : i32
    scf.if %2 {
      %cst_9 = arith.constant 0.000000e+00 : f32
      %12 = vector.broadcast %cst_9 : f32 to vector<128x128xf32>
      %c0_10 = arith.constant 0 : index
      %c0_11 = arith.constant 0 : index
      %13 = vector.load %arg6[%c0_10, %c0_11] : memref<128x128xf32, #tpu.memory_space<vmem>>, vector<128x128xf32>
      tpu.vector_store %arg6[%c0_10, %c0_11], %12 {strides = array<i32>} : memref<128x128xf32, #tpu.memory_space<vmem>>, vector<128x128xf32>,
    } else {
    }
    %c0 = arith.constant 0 : index
    %c0_1 = arith.constant 0 : index
    %3 = vector.load %arg6[%c0, %c0_1] : memref<128x128xf32, #tpu.memory_space<vmem>>, vector<128x128xf32>
    %c0_2 = arith.constant 0 : index
    %c0_3 = arith.constant 0 : index
    %4 = vector.load %arg2[%c0_2, %c0_3] : memref<128x128xf32, #tpu.memory_space<vmem>>, vector<128x128xf32>
    %c0_4 = arith.constant 0 : index
    %c0_5 = arith.constant 0 : index
    %5 = vector.load %arg3[%c0_4, %c0_5] : memref<128x128xf32, #tpu.memory_space<vmem>>, vector<128x128xf32>
    %cst = arith.constant dense<0.000000e+00> : vector<128x128xf32>
    %6 = tpu.matmul %4, %5, %cst {dimension_numbers = #tpu.dot_dimension_numbers<[1], [0], [0], [1], [0, 0, 1, 1], [], []>} : vector<128x128xf32>, vector<128x128xf32>, vector<128x128xf32> -> vector<128x128xf32>
    %7 = arith.addf %3, %6 : vector<128x128xf32>
    %c0_6 = arith.constant 0 : index
    %c0_7 = arith.constant 0 : index
    %8 = vector.load %arg6[%c0_6, %c0_7] : memref<128x128xf32, #tpu.memory_space<vmem>>, vector<128x128xf32>
    tpu.vector_store %arg6[%c0_6, %c0_7], %7 {strides = array<i32>} : memref<128x128xf32, #tpu.memory_space<vmem>>, vector<128x128xf32>,
    %c1_i32 = arith.constant 1 : i32
    %9 = arith.cmpi eq, %arg1, %c1_i32 : i32
    %10 = arith.extui %9 : i1 to i32
    %c0_i32_8 = arith.constant 0 : i32
    %11 = arith.cmpi ne, %10, %c0_i32_8 : i32
    scf.if %11 {
      %c0_9 = arith.constant 0 : index
      %c0_10 = arith.constant 0 : index
      %12 = vector.load %arg6[%c0_9, %c0_10] : memref<128x128xf32, #tpu.memory_space<vmem>>, vector<128x128xf32>
      %c0_11 = arith.constant 0 : index
      %c0_12 = arith.constant 0 : index
      %13 = vector.load %arg4[%c0_11, %c0_12] : memref<1x128xf32, #tpu.memory_space<vmem>>, vector<1x128xf32>
      %14 = vector.broadcast %13 : vector<1x128xf32> to vector<128x128xf32>
      %15 = arith.addf %12, %14 : vector<128x128xf32>
      %c0_13 = arith.constant 0 : index
      %c0_14 = arith.constant 0 : index
      %16 = vector.load %arg5[%c0_13, %c0_14] : memref<128x128xf32, #tpu.memory_space<vmem>>, vector<128x128xf32>
      tpu.vector_store %arg5[%c0_13, %c0_14], %15 {strides = array<i32>} : memref<128x128xf32, #tpu.memory_space<vmem>>, vector<128x128xf32>,
    } else {
    }
    return
  }
  func.func @transform_0(%arg0: i32, %arg1: i32) -> (i32, i32) {
    %c0_i32 = arith.constant 0 : i32
    return %arg0, %arg1 : i32, i32
  }
  func.func @transform_1(%arg0: i32, %arg1: i32) -> (i32, i32) {
    %c0_i32 = arith.constant 0 : i32
    %c0_i32_0 = arith.constant 0 : i32
    return %arg1, %c0_i32 : i32, i32
  }
  func.func @transform_2(%arg0: i32, %arg1: i32) -> (i32, i32) {
    %c0_i32 = arith.constant 0 : i32
    %c0_i32_0 = arith.constant 0 : i32
    %c0_i32_1 = arith.constant 0 : i32
    return %c0_i32, %c0_i32_0 : i32, i32
  }
  func.func @transform_3(%arg0: i32, %arg1: i32) -> (i32, i32) {
    %c0_i32 = arith.constant 0 : i32
    %c0_i32_0 = arith.constant 0 : i32
    return %arg0, %c0_i32 : i32, i32
  }
}

</mosaic_0001>

<bundles_post_ra>
// kernel: gcn_forward.2
= control target key start
LH: loop header
LB: loop body
LE: loop exit
PB: predicated region body
PF: predicated region fallthrough
CT: control target
= control target key end

     0   :  { %s598_s9 = smov 0   ;;  %s600_s10 = smov 0   ;;  %s725_s0 = inlined_call_operand.vmem [shape: f32[256,128], index: 0, kind: input, shape index: {}]   ;;  %s726_s1 = inlined_call_operand.vmem [shape: f32[128,128], index: 1, kind: input, shape index: {}]   ;;  %s727_s2 = inlined_call_operand.vmem [shape: f32[256,128], index: 2, kind: output, shape index: {}]  }
   0x1   :  { %s602_s11 = smov 0  }
   0x2 LB: > { %s24_s12 = sadd.s32 1, %s577_s10  ;;  %p480_p0 = scmp.ge.s32.totalorder %s581_s11, 1  ;;  %s581_s11 = sphi %s602_s11, %s12_s11   ;;  %s577_s10 = sphi %s600_s10, %s729_s10   ;;  %s573_s9 = sphi %s598_s9, %s728_s9  }
   0x3   : > { %p26_p1 = scmp.ge.s32.totalorder %s24_s12, 2  ;;  %p141_p2 = scmp.lt.s32.totalorder %s581_s11, 3 }
   0x5   : > { %s731_s12 = smov (%p26_p1, %s24_s12), 0  ;;  %p142_p3 = pnand %p480_p0, %p141_p2 }
   0x6   : > { %s481_s29 = sshll.u32 (!%p142_p3), %s573_s9, 4 }
   0x7   : > { %145 = sbr.rel (%p142_p3) target bundleno = 202 (0xca), region = 28  ;;  %p172_p4 = scmp.lt.s32.totalorder (!%p142_p3), %s481_s29, 31 }
   0xc   : > { %v259_v0 = vld [vmem:[%s726_s1 + $0x78] sm:$0xff]  ;;  %v258_v1 = vld [vmem:[%s726_s1 + $0x70] sm:$0xff]  ;;  %v257_v2 = vld [vmem:[%s726_s1 + $0x68] sm:$0xff]  ;;  %s733_s29 = smov (!%p172_p4, %s481_s29), 31 }
   0xd   : > { %488 = vmatpush.msra.mxu2 %v259_v0  ;;  %489 = vmatpush.msra.mxu3 %v259_v0  ;;  %v256_v3 = vld [vmem:[%s726_s1 + $0x60] sm:$0xff]  ;;  %v255_v4 = vld [vmem:[%s726_s1 + $0x58] sm:$0xff]  ;;  %v254_v5 = vld [vmem:[%s726_s1 + $0x50] sm:$0xff]  ;;  %s482_s15 = sshll.u32 %s733_s29, 3 }
   0xe   : > { %260 = vmatpush.msra.mxu0 %v259_v0  ;;  %487 = vmatpush.msra.mxu1 %v259_v0  ;;  %v253_v6 = vld [vmem:[%s726_s1 + $0x48] sm:$0xff]  ;;  %v252_v7 = vld [vmem:[%s726_s1 + $0x40] sm:$0xff]  ;;  %v251_v8 = vld [vmem:[%s726_s1 + $0x38] sm:$0xff]  ;;  %s672_s22 = scalar_lea.vmem %s725_s0, %s482_s15  ;;  %s698_s27 = scalar_lea.vmem %s727_s2, %s482_s15 }
   0xf   : > { %491 = vmatpush.msra.mxu2 %v258_v1  ;;  %492 = vmatpush.msra.mxu3 %v258_v1  ;;  %v250_v9 = vld [vmem:[%s726_s1 + $0x30] sm:$0xff]  ;;  %v249_v10 = vld [vmem:[%s726_s1 + $0x28] sm:$0xff]  ;;  %v248_v11 = vld [vmem:[%s726_s1 + $0x20] sm:$0xff] }
  0x10   : > { %261 = vmatpush.msra.mxu0 %v258_v1  ;;  %490 = vmatpush.msra.mxu1 %v258_v1  ;;  %v247_v12 = vld [vmem:[%s726_s1 + $0x18] sm:$0xff]  ;;  %v246_v13 = vld [vmem:[%s726_s1 + $0x10] sm:$0xff]  ;;  %v245_v14 = vld [vmem:[%s726_s1 + $0x8] sm:$0xff] }
  0x11   : > { %494 = vmatpush.msra.mxu2 %v257_v2  ;;  %495 = vmatpush.msra.mxu3 %v257_v2  ;;  %v244_v15 = vld [vmem:[%s726_s1] sm:$0xff]  ;;  %v237_v20 = vld [vmem:[%s672_s22 + $0x48] sm:$0xff]  ;;  %v238_v24 = vld [vmem:[%s672_s22 + $0x50] sm:$0xff] }
  0x12   : > { %262 = vmatpush.msra.mxu0 %v257_v2  ;;  %493 = vmatpush.msra.mxu1 %v257_v2  ;;  %v236_v16 = vld [vmem:[%s672_s22 + $0x40] sm:$0xff]  ;;  %v241_v21 = vld [vmem:[%s672_s22 + $0x68] sm:$0xff]  ;;  %v242_v25 = vld [vmem:[%s672_s22 + $0x70] sm:$0xff] }
  0x13   : > { %497 = vmatpush.msra.mxu2 %v256_v3  ;;  %498 = vmatpush.msra.mxu3 %v256_v3  ;;  %v240_v17 = vld [vmem:[%s672_s22 + $0x60] sm:$0xff]  ;;  %v229_v22 = vld [vmem:[%s672_s22 + $0x8] sm:$0xff]  ;;  %v230_v26 = vld [vmem:[%s672_s22 + $0x10] sm:$0xff] }
  0x14   : > { %263 = vmatpush.msra.mxu0 %v256_v3  ;;  %496 = vmatpush.msra.mxu1 %v256_v3  ;;  %v228_v18 = vld [vmem:[%s672_s22] sm:$0xff]  ;;  %v233_v23 = vld [vmem:[%s672_s22 + $0x28] sm:$0xff]  ;;  %v234_v27 = vld [vmem:[%s672_s22 + $0x30] sm:$0xff] }
  0x15   : > { %500 = vmatpush.msra.mxu2 %v255_v4  ;;  %501 = vmatpush.msra.mxu3 %v255_v4  ;;  %v232_v19 = vld [vmem:[%s672_s22 + $0x20] sm:$0xff]  ;;  %v239_v28 = vld [vmem:[%s672_s22 + $0x58] sm:$0xff] }
  0x16   : > { %264 = vmatpush.msra.mxu0 %v255_v4  ;;  %499 = vmatpush.msra.mxu1 %v255_v4  ;;  %v243_v29 = vld [vmem:[%s672_s22 + $0x78] sm:$0xff] }
  0x17   : > { %503 = vmatpush.msra.mxu2 %v254_v5  ;;  %504 = vmatpush.msra.mxu3 %v254_v5  ;;  %v231_v30 = vld [vmem:[%s672_s22 + $0x18] sm:$0xff] }
  0x18   : > { %265 = vmatpush.msra.mxu0 %v254_v5  ;;  %502 = vmatpush.msra.mxu1 %v254_v5  ;;  %v235_v31 = vld [vmem:[%s672_s22 + $0x38] sm:$0xff] }
  0x19   : > { %506 = vmatpush.msra.mxu2 %v253_v6  ;;  %507 = vmatpush.msra.mxu3 %v253_v6 }
  0x1a   : > { %266 = vmatpush.msra.mxu0 %v253_v6  ;;  %505 = vmatpush.msra.mxu1 %v253_v6 }
  0x1b   : > { %509 = vmatpush.msra.mxu2 %v252_v7  ;;  %510 = vmatpush.msra.mxu3 %v252_v7 }
  0x1c   : > { %267 = vmatpush.msra.mxu0 %v252_v7  ;;  %508 = vmatpush.msra.mxu1 %v252_v7 }
  0x1d   : > { %512 = vmatpush.msra.mxu2 %v251_v8  ;;  %513 = vmatpush.msra.mxu3 %v251_v8 }
  0x1e   : > { %268 = vmatpush.msra.mxu0 %v251_v8  ;;  %511 = vmatpush.msra.mxu1 %v251_v8 }
  0x1f   : > { %515 = vmatpush.msra.mxu2 %v250_v9  ;;  %516 = vmatpush.msra.mxu3 %v250_v9 }
  0x20   : > { %269 = vmatpush.msra.mxu0 %v250_v9  ;;  %514 = vmatpush.msra.mxu1 %v250_v9 }
  0x21   : > { %518 = vmatpush.msra.mxu2 %v249_v10  ;;  %519 = vmatpush.msra.mxu3 %v249_v10 }
  0x22   : > { %270 = vmatpush.msra.mxu0 %v249_v10  ;;  %517 = vmatpush.msra.mxu1 %v249_v10 }
  0x23   : > { %521 = vmatpush.msra.mxu2 %v248_v11  ;;  %522 = vmatpush.msra.mxu3 %v248_v11 }
  0x24   : > { %271 = vmatpush.msra.mxu0 %v248_v11  ;;  %520 = vmatpush.msra.mxu1 %v248_v11 }
  0x25   : > { %524 = vmatpush.msra.mxu2 %v247_v12  ;;  %525 = vmatpush.msra.mxu3 %v247_v12 }
  0x26   : > { %272 = vmatpush.msra.mxu0 %v247_v12  ;;  %523 = vmatpush.msra.mxu1 %v247_v12 }
  0x27   : > { %527 = vmatpush.msra.mxu2 %v246_v13  ;;  %528 = vmatpush.msra.mxu3 %v246_v13 }
  0x28   : > { %273 = vmatpush.msra.mxu0 %v246_v13  ;;  %526 = vmatpush.msra.mxu1 %v246_v13 }
  0x29   : > { %530 = vmatpush.msra.mxu2 %v245_v14  ;;  %531 = vmatpush.msra.mxu3 %v245_v14 }
  0x2a   : > { %274 = vmatpush.msra.mxu0 %v245_v14  ;;  %529 = vmatpush.msra.mxu1 %v245_v14 }
  0x2b   : > { %533 = vmatpush.msra.mxu2 %v244_v15  ;;  %534 = vmatpush.msra.mxu3 %v244_v15 }
  0x2c   : > { %300 = vmatmul.f32.vlgmr.msra.gmra.mxu2 %v236_v16  ;;  %312 = vmatmul.f32.vlgmr.msra.gmra.mxu3 %v240_v17 }
  0x2d   : > { %275 = vmatpush.msra.mxu0 %v244_v15  ;;  %532 = vmatpush.msra.mxu1 %v244_v15 }
  0x2e   : > { %276 = vmatmul.f32.vlgmr.msra.gmra.mxu0 %v228_v18  ;;  %288 = vmatmul.f32.vlgmr.msra.gmra.mxu1 %v232_v19 }
  0x34   : > { %303 = vmatmul.f32.gmra.mxu2 %v237_v20  ;;  %315 = vmatmul.f32.gmra.mxu3 %v241_v21 }
  0x36   : > { %279 = vmatmul.f32.gmra.mxu0 %v229_v22  ;;  %291 = vmatmul.f32.gmra.mxu1 %v233_v23 }
  0x3c   : > { %306 = vmatmul.f32.gmra.mxu2 %v238_v24  ;;  %318 = vmatmul.f32.gmra.mxu3 %v242_v25 }
  0x3e   : > { %282 = vmatmul.f32.gmra.mxu0 %v230_v26  ;;  %294 = vmatmul.f32.gmra.mxu1 %v234_v27 }
  0x44   : > { %309 = vmatmul.f32.gmra.mxu2 %v239_v28  ;;  %321 = vmatmul.f32.gmra.mxu3 %v243_v29 }
  0x46   : > { %285 = vmatmul.f32.gmra.mxu0 %v231_v30  ;;  %297 = vmatmul.f32.gmra.mxu1 %v235_v31 }
  0xab   : > { %v277_v32 = vpop.f32.mrf.mxu0  ;;  %v289_v33 = vpop.f32.mrf.mxu1 }
  0xac   : > { %376 = vst [vmem:[%s698_s27] sm:$0xff] %v277_v32 }
  0xad   : > { %380 = vst [vmem:[%s698_s27 + $0x20] sm:$0xff] %v289_v33 }
  0xaf   : > { %v301_v34 = vpop.f32.mrf.mxu2  ;;  %v313_v35 = vpop.f32.mrf.mxu3 }
  0xb0   : > { %384 = vst [vmem:[%s698_s27 + $0x40] sm:$0xff] %v301_v34 }
  0xb1   : > { %388 = vst [vmem:[%s698_s27 + $0x60] sm:$0xff] %v313_v35 }
  0xb3   : > { %v280_v36 = vpop.f32.mrf.mxu0  ;;  %v292_v37 = vpop.f32.mrf.mxu1 }
  0xb4   : > { %377 = vst [vmem:[%s698_s27 + $0x8] sm:$0xff] %v280_v36 }
  0xb5   : > { %381 = vst [vmem:[%s698_s27 + $0x28] sm:$0xff] %v292_v37 }
  0xb7   : > { %v304_v38 = vpop.f32.mrf.mxu2  ;;  %v316_v39 = vpop.f32.mrf.mxu3 }
  0xb8   : > { %385 = vst [vmem:[%s698_s27 + $0x48] sm:$0xff] %v304_v38 }
  0xb9   : > { %389 = vst [vmem:[%s698_s27 + $0x68] sm:$0xff] %v316_v39 }
  0xbb   : > { %v283_v40 = vpop.f32.mrf.mxu0  ;;  %v295_v41 = vpop.f32.mrf.mxu1 }
  0xbc   : > { %378 = vst [vmem:[%s698_s27 + $0x10] sm:$0xff] %v283_v40 }
  0xbd   : > { %382 = vst [vmem:[%s698_s27 + $0x30] sm:$0xff] %v295_v41 }
  0xbf   : > { %v307_v42 = vpop.f32.mrf.mxu2  ;;  %v319_v43 = vpop.f32.mrf.mxu3 }
  0xc0   : > { %386 = vst [vmem:[%s698_s27 + $0x50] sm:$0xff] %v307_v42 }
  0xc1   : > { %390 = vst [vmem:[%s698_s27 + $0x70] sm:$0xff] %v319_v43 }
  0xc3   : > { %v286_v44 = vpop.f32.mrf.mxu0  ;;  %v298_v45 = vpop.f32.mrf.mxu1 }
  0xc4   : > { %379 = vst [vmem:[%s698_s27 + $0x18] sm:$0xff] %v286_v44 }
  0xc5   : > { %383 = vst [vmem:[%s698_s27 + $0x38] sm:$0xff] %v298_v45 }
  0xc7   : > { %v310_v46 = vpop.f32.mrf.mxu2  ;;  %v322_v47 = vpop.f32.mrf.mxu3 }
  0xc8   : > { %387 = vst [vmem:[%s698_s27 + $0x58] sm:$0xff] %v310_v46 }
  0xc9   : > { %391 = vst [vmem:[%s698_s27 + $0x78] sm:$0xff] %v322_v47 }
  0xca PF: > { %s12_s11 = sadd.s32 1, %s581_s11   ;;  %s728_s9 = smov %s577_s10 }
  0xcb   : > { %p9_p5 = scmp.ge.s32.totalorder %s12_s11, 4   ;;  %s729_s10 = smov %s731_s12 }
  0xcd   :  { %11 = sbr.rel (!%p9_p5) target bundleno = 2 (0x2), region = 69 }

// kernel: gcn_forward.3
= control target key start
LH: loop header
LB: loop body
LE: loop exit
PB: predicated region body
PF: predicated region fallthrough
CT: control target
= control target key end

     0   :  { %s818_s12 = smov 0   ;;  %s820_s13 = smov 0   ;;  %s987_s0 = inlined_call_operand.vmem [shape: f32[256,256], index: 0, kind: input, shape index: {}]   ;;  %s988_s1 = inlined_call_operand.vmem [shape: f32[256,128], index: 1, kind: input, shape index: {}]   ;;  %s989_s2 = inlined_call_operand.vmem [shape: f32[1,128], index: 2, kind: input, shape index: {}]   ;;  %s990_s3 = inlined_call_operand.vmem [shape: f32[256,128], index: 3, kind: output, shape index: {}]  }
   0x1   :  { %s822_s14 = smov 0   ;;  %s824_s15 = smov 0  }
   0x2   :  { %s826_s16 = smov 0   ;;  %s828_s17 = smov 0  }
   0x3   :  { %s830_s18 = smov 0  }
   0x4 LB: > { %s22_s19 = sadd.s32 1, %s787_s16  ;;  %s25_s20 = sadd.s32 1, %s791_s17  ;;  %s795_s18 = sphi %s830_s18, %s13_s18   ;;  %s791_s17 = sphi %s828_s17, %s996_s17   ;;  %s787_s16 = sphi %s826_s16, %s995_s16   ;;  %s783_s15 = sphi %s824_s15, %s994_s15   ;;  %s779_s14 = sphi %s822_s14, %s993_s14   ;;  %s775_s13 = sphi %s820_s13, %s992_s13   ;;  %s771_s12 = sphi %s818_s12, %s991_s12  }
   0x5   : > { %p23_p0 = scmp.ge.s32.totalorder %s22_s19, 2  ;;  %p41_p1 = scmp.ne.s32.totalorder %s775_s13, %s771_s12 }
   0x6   : > { %p42_p2 = scmp.eq.s32.totalorder %s795_s18, 0  ;;  %s34_s24 = sadd.s32 1, %s775_s13 }
   0x7   : > { %s998_s19 = smov (%p23_p0, %s22_s19), 0  ;;  %s1000_s20 = smov (!%p23_p0, %s25_s20), %s791_s17 }
   0x8   : > { %p43_p3 = por %p42_p2, %p41_p1  ;;  %p27_p4 = scmp.ge.s32.totalorder %s1000_s20, 2 }
   0x9   : > { %s30_s21 = ssub.s32 %s787_s16, %s998_s19  ;;  %p619_p6 = scmp.ge.s32.totalorder %s795_s18, 4 }
   0xa   : > { %s1002_s20 = smov (%p27_p4, %s1000_s20), 0 }
   0xb   : > { %s29_s22 = ssub.s32 %s791_s17, %s1002_s20  ;;  %143 = sbr.rel (%p619_p6) target bundleno = 38 (0x26), region = 20 }
   0xc   : > { %s31_s23 = sor.u32 %s30_s21, %s29_s22 }
   0xd   : > { %p32_p5 = scmp.eq.s32.totalorder %s31_s23, 0 }
   0xf   : > { %s869_s25 = scalar_select %p32_p5, %s775_s13, %s34_s24  }
  0x10   : > { %146 = sbr.rel (!%p43_p3) target bundleno = 38 (0x26), region = 24  ;;  %s148_s26 = sand.u32 (%p43_p3), 1, %s775_s13  }
  0x11   : > { %s634_s27 = sshll.u32 (%p43_p3), %s791_s17, 5  ;;  %s620_s28 = sshll.u32 (%p43_p3), %s148_s26, 7 }
  0x12   : > { %s153_s29 = sadd.s32 (%p43_p3), %s787_s16, %s634_s27  ;;  %s150_s7 = scalar_lea.vmem (%p43_p3), [#allocation3], %s620_s28 }
  0x13   : > { %s623_s30 = sshll.u32 (%p43_p3), %s153_s29, 3 }
  0x14   : > { %s878_s6 = scalar_lea.vmem (%p43_p3), %s987_s0, %s623_s30 }
  0x15   : > { %v214_v0 = vld [vmem:[%s878_s6] sm:$0xff]  ;;  %v216_v1 = vld [vmem:[%s878_s6 + $0x10] sm:$0xff] }
  0x16   : > { %v218_v2 = vld [vmem:[%s878_s6 + $0x20] sm:$0xff]  ;;  %215 = vst [vmem:[%s150_s7] sm:$0xff] %v214_v0  ;;  %v220_v3 = vld [vmem:[%s878_s6 + $0x30] sm:$0xff] }
  0x17   : > { %217 = vst [vmem:[%s150_s7 + $0x8] sm:$0xff] %v216_v1  ;;  %v222_v4 = vld [vmem:[%s878_s6 + $0x40] sm:$0xff]  ;;  %v224_v5 = vld [vmem:[%s878_s6 + $0x50] sm:$0xff] }
  0x18   : > { %219 = vst [vmem:[%s150_s7 + $0x10] sm:$0xff] %v218_v2  ;;  %v226_v6 = vld [vmem:[%s878_s6 + $0x60] sm:$0xff]  ;;  %v228_v7 = vld [vmem:[%s878_s6 + $0x70] sm:$0xff] }
  0x19   : > { %221 = vst [vmem:[%s150_s7 + $0x18] sm:$0xff] %v220_v3  ;;  %v230_v8 = vld [vmem:[%s878_s6 + $0x80] sm:$0xff]  ;;  %v232_v9 = vld [vmem:[%s878_s6 + $0x90] sm:$0xff] }
  0x1a   : > { %223 = vst [vmem:[%s150_s7 + $0x20] sm:$0xff] %v222_v4  ;;  %v234_v10 = vld [vmem:[%s878_s6 + $0xa0] sm:$0xff]  ;;  %v236_v11 = vld [vmem:[%s878_s6 + $0xb0] sm:$0xff] }
  0x1b   : > { %225 = vst [vmem:[%s150_s7 + $0x28] sm:$0xff] %v224_v5  ;;  %v238_v12 = vld [vmem:[%s878_s6 + $0xc0] sm:$0xff]  ;;  %v240_v13 = vld [vmem:[%s878_s6 + $0xd0] sm:$0xff] }
  0x1c   : > { %227 = vst [vmem:[%s150_s7 + $0x30] sm:$0xff] %v226_v6  ;;  %v242_v14 = vld [vmem:[%s878_s6 + $0xe0] sm:$0xff]  ;;  %v244_v15 = vld [vmem:[%s878_s6 + $0xf0] sm:$0xff] }
  0x1d   : > { %229 = vst [vmem:[%s150_s7 + $0x38] sm:$0xff] %v228_v7 }
  0x1e   : > { %231 = vst [vmem:[%s150_s7 + $0x40] sm:$0xff] %v230_v8 }
  0x1f   : > { %233 = vst [vmem:[%s150_s7 + $0x48] sm:$0xff] %v232_v9 }
  0x20   : > { %235 = vst [vmem:[%s150_s7 + $0x50] sm:$0xff] %v234_v10 }
  0x21   : > { %237 = vst [vmem:[%s150_s7 + $0x58] sm:$0xff] %v236_v11 }
  0x22   : > { %239 = vst [vmem:[%s150_s7 + $0x60] sm:$0xff] %v238_v12 }
  0x23   : > { %241 = vst [vmem:[%s150_s7 + $0x68] sm:$0xff] %v240_v13 }
  0x24   : > { %243 = vst [vmem:[%s150_s7 + $0x70] sm:$0xff] %v242_v14 }
  0x25   : > { %245 = vst [vmem:[%s150_s7 + $0x78] sm:$0xff] %v244_v15 }
  0x26 PF: > { %p624_p7 = scmp.ge.s32.totalorder %s795_s18, 1  ;;  %p259_p8 = scmp.lt.s32.totalorder %s795_s18, 5 }
  0x28   : > { %p260_p9 = pnand %p624_p7, %p259_p8 }
  0x29   : > { %s266_s8 = sand.u32 (!%p260_p9), 1, %s771_s12   ;;  %s626_s9 = sshll.u32 (!%p260_p9), %s779_s14, 4 }
  0x2a   : > { %263 = sbr.rel (%p260_p9) target bundleno = 283 (0x11b), region = 66  ;;  %s625_s10 = sshll.u32 (!%p260_p9), %s266_s8, 7 }
  0x2b   : > { %p296_p10 = scmp.lt.s32.totalorder (!%p260_p9), %s626_s9, 31  ;;  %s628_s11 = sshll.u32 (!%p260_p9), %s783_s15, 4 }
  0x2c   : > { %p302_p11 = scmp.lt.s32.totalorder (!%p260_p9), %s628_s11, 31  ;;  %s911_s12 = scalar_lea.vmem (!%p260_p9), [#allocation3], %s625_s10 }
  0x2d   : > { %p630_p12 = scmp.ne.s32.totalorder (!%p260_p9), %s779_s14, 0 }
  0x2f   : > { %s1004_s9 = smov (!%p296_p10, %s626_s9), 31  ;;  %s1006_s11 = smov (!%p302_p11, %s628_s11), 31 }
  0x30   : > { %s627_s21 = sshll.u32 %s1004_s9, 3  ;;  %s629_s26 = sshll.u32 %s1006_s11, 3 }
  0x31   : > { %s904_s24 = scalar_lea.vmem %s988_s1, %s627_s21  ;;  %s909_s29 = scalar_lea.vmem %s990_s3, %s629_s26 }
  0x32   : > { %310 = sbr.rel (%p630_p12) target bundleno = 72 (0x48), region = 74 }
  0x37   : > { %v797_v16 = vmov 0.0  }
  0x38   : > { %311 = vst [vmem:[#allocation2 + $0x30] sm:$0xff] %v797_v16 }
  0x39   : > { %312 = vst [vmem:[#allocation2] sm:$0xff] %v797_v16 }
  0x3a   : > { %313 = vst [vmem:[#allocation2 + $0x58] sm:$0xff] %v797_v16 }
  0x3b   : > { %314 = vst [vmem:[#allocation2 + $0x18] sm:$0xff] %v797_v16 }
  0x3c   : > { %315 = vst [vmem:[#allocation2 + $0x50] sm:$0xff] %v797_v16 }
  0x3d   : > { %316 = vst [vmem:[#allocation2 + $0x68] sm:$0xff] %v797_v16 }
  0x3e   : > { %317 = vst [vmem:[#allocation2 + $0x8] sm:$0xff] %v797_v16 }
  0x3f   : > { %318 = vst [vmem:[#allocation2 + $0x48] sm:$0xff] %v797_v16 }
  0x40   : > { %319 = vst [vmem:[#allocation2 + $0x40] sm:$0xff] %v797_v16 }
  0x41   : > { %320 = vst [vmem:[#allocation2 + $0x20] sm:$0xff] %v797_v16 }
  0x42   : > { %321 = vst [vmem:[#allocation2 + $0x10] sm:$0xff] %v797_v16 }
  0x43   : > { %322 = vst [vmem:[#allocation2 + $0x38] sm:$0xff] %v797_v16 }
  0x44   : > { %323 = vst [vmem:[#allocation2 + $0x60] sm:$0xff] %v797_v16 }
  0x45   : > { %324 = vst [vmem:[#allocation2 + $0x70] sm:$0xff] %v797_v16 }
  0x46   : > { %325 = vst [vmem:[#allocation2 + $0x78] sm:$0xff] %v797_v16 }
  0x47   : > { %326 = vst [vmem:[#allocation2 + $0x28] sm:$0xff] %v797_v16 }
  0x48 PF: > { %v374_v17 = vld [vmem:[%s904_s24 + $0x78] sm:$0xff]  ;;  %v373_v18 = vld [vmem:[%s904_s24 + $0x70] sm:$0xff]  ;;  %v372_v19 = vld [vmem:[%s904_s24 + $0x68] sm:$0xff]  ;;  %p631_p13 = scmp.ne.s32.totalorder %s779_s14, 1 }
  0x49   : > { %636 = vmatpush.msra.mxu2 %v374_v17  ;;  %637 = vmatpush.msra.mxu3 %v374_v17  ;;  %v371_v20 = vld [vmem:[%s904_s24 + $0x60] sm:$0xff]  ;;  %v370_v21 = vld [vmem:[%s904_s24 + $0x58] sm:$0xff]  ;;  %v369_v22 = vld [vmem:[%s904_s24 + $0x50] sm:$0xff] }
  0x4a   : > { %375 = vmatpush.msra.mxu0 %v374_v17  ;;  %635 = vmatpush.msra.mxu1 %v374_v17  ;;  %v368_v23 = vld [vmem:[%s904_s24 + $0x48] sm:$0xff]  ;;  %v367_v24 = vld [vmem:[%s904_s24 + $0x40] sm:$0xff]  ;;  %v366_v25 = vld [vmem:[%s904_s24 + $0x38] sm:$0xff] }
  0x4b   : > { %639 = vmatpush.msra.mxu2 %v373_v18  ;;  %640 = vmatpush.msra.mxu3 %v373_v18  ;;  %v365_v26 = vld [vmem:[%s904_s24 + $0x30] sm:$0xff]  ;;  %v364_v27 = vld [vmem:[%s904_s24 + $0x28] sm:$0xff]  ;;  %v363_v28 = vld [vmem:[%s904_s24 + $0x20] sm:$0xff] }
  0x4c   : > { %376 = vmatpush.msra.mxu0 %v373_v18  ;;  %638 = vmatpush.msra.mxu1 %v373_v18  ;;  %v362_v29 = vld [vmem:[%s904_s24 + $0x18] sm:$0xff]  ;;  %v361_v30 = vld [vmem:[%s904_s24 + $0x10] sm:$0xff]  ;;  %v360_v31 = vld [vmem:[%s904_s24 + $0x8] sm:$0xff] }
  0x4d   : > { %642 = vmatpush.msra.mxu2 %v372_v19  ;;  %643 = vmatpush.msra.mxu3 %v372_v19  ;;  %v359_v32 = vld [vmem:[%s904_s24] sm:$0xff]  ;;  %v352_v37 = vld [vmem:[%s911_s12 + $0x48] sm:$0xff]  ;;  %v353_v41 = vld [vmem:[%s911_s12 + $0x50] sm:$0xff] }
  0x4e   : > { %377 = vmatpush.msra.mxu0 %v372_v19  ;;  %641 = vmatpush.msra.mxu1 %v372_v19  ;;  %v351_v33 = vld [vmem:[%s911_s12 + $0x40] sm:$0xff]  ;;  %v356_v38 = vld [vmem:[%s911_s12 + $0x68] sm:$0xff]  ;;  %v357_v42 = vld [vmem:[%s911_s12 + $0x70] sm:$0xff] }
  0x4f   : > { %645 = vmatpush.msra.mxu2 %v371_v20  ;;  %646 = vmatpush.msra.mxu3 %v371_v20  ;;  %v355_v34 = vld [vmem:[%s911_s12 + $0x60] sm:$0xff]  ;;  %v344_v39 = vld [vmem:[%s911_s12 + $0x8] sm:$0xff]  ;;  %v345_v43 = vld [vmem:[%s911_s12 + $0x10] sm:$0xff] }
  0x50   : > { %378 = vmatpush.msra.mxu0 %v371_v20  ;;  %644 = vmatpush.msra.mxu1 %v371_v20  ;;  %v343_v35 = vld [vmem:[%s911_s12] sm:$0xff]  ;;  %v348_v40 = vld [vmem:[%s911_s12 + $0x28] sm:$0xff]  ;;  %v349_v44 = vld [vmem:[%s911_s12 + $0x30] sm:$0xff] }
  0x51   : > { %648 = vmatpush.msra.mxu2 %v370_v21  ;;  %649 = vmatpush.msra.mxu3 %v370_v21  ;;  %v347_v36 = vld [vmem:[%s911_s12 + $0x20] sm:$0xff]  ;;  %v354_v45 = vld [vmem:[%s911_s12 + $0x58] sm:$0xff]  ;;  %v327_v49 = vld [vmem:[#allocation2 + $0x30] sm:$0xff] }
  0x52   : > { %379 = vmatpush.msra.mxu0 %v370_v21  ;;  %647 = vmatpush.msra.mxu1 %v370_v21  ;;  %v358_v46 = vld [vmem:[%s911_s12 + $0x78] sm:$0xff]  ;;  %v331_v50 = vld [vmem:[#allocation2 + $0x50] sm:$0xff]  ;;  %v335_v55 = vld [vmem:[#allocation2 + $0x40] sm:$0xff] }
  0x53   : > { %651 = vmatpush.msra.mxu2 %v369_v22  ;;  %652 = vmatpush.msra.mxu3 %v369_v22  ;;  %v346_v47 = vld [vmem:[%s911_s12 + $0x18] sm:$0xff]  ;;  %v339_v56 = vld [vmem:[#allocation2 + $0x60] sm:$0xff]  ;;  %v332_v62 = vld [vmem:[#allocation2 + $0x68] sm:$0xff] }
  0x54   : > { %380 = vmatpush.msra.mxu0 %v369_v22  ;;  %650 = vmatpush.msra.mxu1 %v369_v22  ;;  %v350_v48 = vld [vmem:[%s911_s12 + $0x38] sm:$0xff]  ;;  %v328_v61 = vld [vmem:[#allocation2] sm:$0xff]  ;;  %v340_v4 = vld [vmem:[#allocation2 + $0x70] sm:$0xff] }
  0x55   : > { %654 = vmatpush.msra.mxu2 %v368_v23  ;;  %655 = vmatpush.msra.mxu3 %v368_v23  ;;  %v336_v3 = vld [vmem:[#allocation2 + $0x20] sm:$0xff]  ;;  %v329_v9 = vld [vmem:[#allocation2 + $0x58] sm:$0xff]  ;;  %v333_v10 = vld [vmem:[#allocation2 + $0x8] sm:$0xff] }
  0x56   : > { %381 = vmatpush.msra.mxu0 %v368_v23  ;;  %653 = vmatpush.msra.mxu1 %v368_v23  ;;  %v337_v15 = vld [vmem:[#allocation2 + $0x10] sm:$0xff]  ;;  %v341_v16 = vld [vmem:[#allocation2 + $0x78] sm:$0xff]  ;;  %v334_v22 = vld [vmem:[#allocation2 + $0x48] sm:$0xff] }
  0x57   : > { %657 = vmatpush.msra.mxu2 %v367_v24  ;;  %658 = vmatpush.msra.mxu3 %v367_v24  ;;  %v330_v21 = vld [vmem:[#allocation2 + $0x18] sm:$0xff] }
  0x58   : > { %382 = vmatpush.msra.mxu0 %v367_v24  ;;  %656 = vmatpush.msra.mxu1 %v367_v24 }
  0x59   : > { %660 = vmatpush.msra.mxu2 %v366_v25  ;;  %661 = vmatpush.msra.mxu3 %v366_v25 }
  0x5a   : > { %383 = vmatpush.msra.mxu0 %v366_v25  ;;  %659 = vmatpush.msra.mxu1 %v366_v25 }
  0x5b   : > { %663 = vmatpush.msra.mxu2 %v365_v26  ;;  %664 = vmatpush.msra.mxu3 %v365_v26 }
  0x5c   : > { %384 = vmatpush.msra.mxu0 %v365_v26  ;;  %662 = vmatpush.msra.mxu1 %v365_v26 }
  0x5d   : > { %666 = vmatpush.msra.mxu2 %v364_v27  ;;  %667 = vmatpush.msra.mxu3 %v364_v27 }
  0x5e   : > { %385 = vmatpush.msra.mxu0 %v364_v27  ;;  %665 = vmatpush.msra.mxu1 %v364_v27  ;;  %v338_v27 = vld [vmem:[#allocation2 + $0x38] sm:$0xff] }
  0x5f   : > { %669 = vmatpush.msra.mxu2 %v363_v28  ;;  %670 = vmatpush.msra.mxu3 %v363_v28 }
  0x60   : > { %386 = vmatpush.msra.mxu0 %v363_v28  ;;  %668 = vmatpush.msra.mxu1 %v363_v28  ;;  %v342_v28 = vld [vmem:[#allocation2 + $0x28] sm:$0xff] }
  0x61   : > { %672 = vmatpush.msra.mxu2 %v362_v29  ;;  %673 = vmatpush.msra.mxu3 %v362_v29 }
  0x62   : > { %387 = vmatpush.msra.mxu0 %v362_v29  ;;  %671 = vmatpush.msra.mxu1 %v362_v29 }
  0x63   : > { %675 = vmatpush.msra.mxu2 %v361_v30  ;;  %676 = vmatpush.msra.mxu3 %v361_v30 }
  0x64   : > { %388 = vmatpush.msra.mxu0 %v361_v30  ;;  %674 = vmatpush.msra.mxu1 %v361_v30 }
  0x65   : > { %678 = vmatpush.msra.mxu2 %v360_v31  ;;  %679 = vmatpush.msra.mxu3 %v360_v31 }
  0x66   : > { %389 = vmatpush.msra.mxu0 %v360_v31  ;;  %677 = vmatpush.msra.mxu1 %v360_v31 }
  0x67   : > { %681 = vmatpush.msra.mxu2 %v359_v32  ;;  %682 = vmatpush.msra.mxu3 %v359_v32 }
  0x68   : > { %415 = vmatmul.f32.vlgmr.msra.gmra.mxu2 %v351_v33  ;;  %427 = vmatmul.f32.vlgmr.msra.gmra.mxu3 %v355_v34 }
  0x69   : > { %390 = vmatpush.msra.mxu0 %v359_v32  ;;  %680 = vmatpush.msra.mxu1 %v359_v32 }
  0x6a   : > { %391 = vmatmul.f32.vlgmr.msra.gmra.mxu0 %v343_v35  ;;  %403 = vmatmul.f32.vlgmr.msra.gmra.mxu1 %v347_v36 }
  0x70   : > { %418 = vmatmul.f32.gmra.mxu2 %v352_v37  ;;  %430 = vmatmul.f32.gmra.mxu3 %v356_v38 }
  0x72   : > { %394 = vmatmul.f32.gmra.mxu0 %v344_v39  ;;  %406 = vmatmul.f32.gmra.mxu1 %v348_v40 }
  0x78   : > { %421 = vmatmul.f32.gmra.mxu2 %v353_v41  ;;  %433 = vmatmul.f32.gmra.mxu3 %v357_v42 }
  0x7a   : > { %397 = vmatmul.f32.gmra.mxu0 %v345_v43  ;;  %409 = vmatmul.f32.gmra.mxu1 %v349_v44 }
  0x80   : > { %424 = vmatmul.f32.gmra.mxu2 %v354_v45  ;;  %436 = vmatmul.f32.gmra.mxu3 %v358_v46 }
  0x82   : > { %400 = vmatmul.f32.gmra.mxu0 %v346_v47  ;;  %412 = vmatmul.f32.gmra.mxu1 %v350_v48 }
  0xe7   : > { %v392_v51 = vpop.f32.mrf.mxu0  ;;  %v404_v52 = vpop.f32.mrf.mxu1 }
  0xe8   : > { %v440_v53 = vadd.f32 %v392_v51, %v327_v49  ;;  %v444_v54 = vadd.f32 %v404_v52, %v331_v50 }
  0xea   : > { %456 = vst [vmem:[#allocation2 + $0x30] sm:$0xff] %v440_v53 }
  0xeb   : > { %460 = vst [vmem:[#allocation2 + $0x50] sm:$0xff] %v444_v54  ;;  %v416_v57 = vpop.f32.mrf.mxu2  ;;  %v428_v58 = vpop.f32.mrf.mxu3 }
  0xec   : > { %v448_v59 = vadd.f32 %v416_v57, %v335_v55  ;;  %v452_v60 = vadd.f32 %v428_v58, %v339_v56 }
  0xee   : > { %464 = vst [vmem:[#allocation2 + $0x40] sm:$0xff] %v448_v59 }
  0xef   : > { %468 = vst [vmem:[#allocation2 + $0x60] sm:$0xff] %v452_v60  ;;  %v395_v63 = vpop.f32.mrf.mxu0  ;;  %v407_v0 = vpop.f32.mrf.mxu1 }
  0xf0   : > { %v441_v1 = vadd.f32 %v395_v63, %v328_v61  ;;  %v445_v2 = vadd.f32 %v407_v0, %v332_v62 }
  0xf2   : > { %457 = vst [vmem:[#allocation2] sm:$0xff] %v441_v1 }
  0xf3   : > { %461 = vst [vmem:[#allocation2 + $0x68] sm:$0xff] %v445_v2  ;;  %v419_v5 = vpop.f32.mrf.mxu2  ;;  %v431_v6 = vpop.f32.mrf.mxu3 }
  0xf4   : > { %v449_v7 = vadd.f32 %v419_v5, %v336_v3  ;;  %v453_v8 = vadd.f32 %v431_v6, %v340_v4 }
  0xf6   : > { %465 = vst [vmem:[#allocation2 + $0x20] sm:$0xff] %v449_v7 }
  0xf7   : > { %469 = vst [vmem:[#allocation2 + $0x70] sm:$0xff] %v453_v8  ;;  %v398_v11 = vpop.f32.mrf.mxu0  ;;  %v410_v12 = vpop.f32.mrf.mxu1 }
  0xf8   : > { %v442_v13 = vadd.f32 %v398_v11, %v329_v9  ;;  %v446_v14 = vadd.f32 %v410_v12, %v333_v10 }
  0xfa   : > { %458 = vst [vmem:[#allocation2 + $0x58] sm:$0xff] %v442_v13 }
  0xfb   : > { %462 = vst [vmem:[#allocation2 + $0x8] sm:$0xff] %v446_v14  ;;  %v422_v17 = vpop.f32.mrf.mxu2  ;;  %v434_v18 = vpop.f32.mrf.mxu3 }
  0xfc   : > { %v450_v19 = vadd.f32 %v422_v17, %v337_v15  ;;  %v454_v20 = vadd.f32 %v434_v18, %v341_v16 }
  0xfe   : > { %466 = vst [vmem:[#allocation2 + $0x10] sm:$0xff] %v450_v19 }
  0xff   : > { %470 = vst [vmem:[#allocation2 + $0x78] sm:$0xff] %v454_v20  ;;  %v401_v23 = vpop.f32.mrf.mxu0  ;;  %v413_v24 = vpop.f32.mrf.mxu1 }
 0x100   : > { %v443_v25 = vadd.f32 %v401_v23, %v330_v21  ;;  %v447_v26 = vadd.f32 %v413_v24, %v334_v22 }
 0x102   : > { %459 = vst [vmem:[#allocation2 + $0x18] sm:$0xff] %v443_v25 }
 0x103   : > { %463 = vst [vmem:[#allocation2 + $0x48] sm:$0xff] %v447_v26  ;;  %v425_v29 = vpop.f32.mrf.mxu2  ;;  %v437_v30 = vpop.f32.mrf.mxu3  ;;  %475 = sbr.rel (%p631_p13) target bundleno = 283 (0x11b), region = 78 }
 0x104   : > { %v451_v31 = vadd.f32 %v425_v29, %v338_v27  ;;  %v455_v32 = vadd.f32 %v437_v30, %v342_v28 }
 0x106   : > { %467 = vst [vmem:[#allocation2 + $0x38] sm:$0xff] %v451_v31 }
 0x107   : > { %471 = vst [vmem:[#allocation2 + $0x28] sm:$0xff] %v455_v32 }
 0x108   : > { %v476_v33 = vld [vmem:[#allocation2 + $0x30] sm:$0xff]  ;;  %v740_v34 = vld [vmem:[%s989_s2] ss:$0 sm:$0xff]  ;;  %v478_v36 = vld [vmem:[#allocation2 + $0x58] sm:$0xff] }
 0x109   : > { %v477_v35 = vld [vmem:[#allocation2] sm:$0xff]  ;;  %v479_v37 = vld [vmem:[#allocation2 + $0x18] sm:$0xff]  ;;  %v496_v38 = vadd.f32 %v740_v34, %v476_v33  ;;  %v498_v40 = vadd.f32 %v740_v34, %v478_v36  ;;  %v480_v41 = vld [vmem:[#allocation2 + $0x50] sm:$0xff] }
 0x10a   : > { %v497_v39 = vadd.f32 %v740_v34, %v477_v35  ;;  %v481_v42 = vld [vmem:[#allocation2 + $0x68] sm:$0xff]  ;;  %v499_v43 = vadd.f32 %v740_v34, %v479_v37  ;;  %v500_v45 = vadd.f32 %v740_v34, %v480_v41  ;;  %v484_v48 = vld [vmem:[#allocation2 + $0x40] sm:$0xff]  ;;  %v486_v52 = vld [vmem:[#allocation2 + $0x10] sm:$0xff] }
 0x10b   : > { %v482_v44 = vld [vmem:[#allocation2 + $0x8] sm:$0xff]  ;;  %512 = vst [vmem:[%s909_s29] sm:$0xff] %v496_v38  ;;  %v501_v47 = vadd.f32 %v740_v34, %v481_v42  ;;  %v485_v50 = vld [vmem:[#allocation2 + $0x20] sm:$0xff]  ;;  %v504_v53 = vadd.f32 %v740_v34, %v484_v48  ;;  %v506_v57 = vadd.f32 %v740_v34, %v486_v52  ;;  %v489_v58 = vld [vmem:[#allocation2 + $0x70] sm:$0xff] }
 0x10c   : > { %v483_v46 = vld [vmem:[#allocation2 + $0x48] sm:$0xff]  ;;  %513 = vst [vmem:[%s909_s29 + $0x8] sm:$0xff] %v497_v39  ;;  %v502_v49 = vadd.f32 %v740_v34, %v482_v44  ;;  %v505_v55 = vadd.f32 %v740_v34, %v485_v50  ;;  %v488_v56 = vld [vmem:[#allocation2 + $0x60] sm:$0xff]  ;;  %v490_v60 = vld [vmem:[#allocation2 + $0x78] sm:$0xff]  ;;  %v509_v63 = vadd.f32 %v740_v34, %v489_v58 }
 0x10d   : > { %514 = vst [vmem:[%s909_s29 + $0x10] sm:$0xff] %v498_v40  ;;  %v503_v51 = vadd.f32 %v740_v34, %v483_v46  ;;  %v487_v54 = vld [vmem:[#allocation2 + $0x38] sm:$0xff]  ;;  %v508_v61 = vadd.f32 %v740_v34, %v488_v56  ;;  %v510_v0 = vadd.f32 %v740_v34, %v490_v60 }
 0x10e   : > { %515 = vst [vmem:[%s909_s29 + $0x18] sm:$0xff] %v499_v43  ;;  %v507_v59 = vadd.f32 %v740_v34, %v487_v54  ;;  %v491_v62 = vld [vmem:[#allocation2 + $0x28] sm:$0xff] }
 0x10f   : > { %516 = vst [vmem:[%s909_s29 + $0x20] sm:$0xff] %v500_v45  ;;  %v511_v1 = vadd.f32 %v740_v34, %v491_v62 }
 0x110   : > { %517 = vst [vmem:[%s909_s29 + $0x28] sm:$0xff] %v501_v47 }
 0x111   : > { %518 = vst [vmem:[%s909_s29 + $0x30] sm:$0xff] %v502_v49 }
 0x112   : > { %519 = vst [vmem:[%s909_s29 + $0x38] sm:$0xff] %v503_v51 }
 0x113   : > { %520 = vst [vmem:[%s909_s29 + $0x40] sm:$0xff] %v504_v53 }
 0x114   : > { %521 = vst [vmem:[%s909_s29 + $0x48] sm:$0xff] %v505_v55 }
 0x115   : > { %522 = vst [vmem:[%s909_s29 + $0x50] sm:$0xff] %v506_v57 }
 0x116   : > { %523 = vst [vmem:[%s909_s29 + $0x58] sm:$0xff] %v507_v59 }
 0x117   : > { %524 = vst [vmem:[%s909_s29 + $0x60] sm:$0xff] %v508_v61 }
 0x118   : > { %525 = vst [vmem:[%s909_s29 + $0x68] sm:$0xff] %v509_v63 }
 0x119   : > { %526 = vst [vmem:[%s909_s29 + $0x70] sm:$0xff] %v510_v0 }
 0x11a   : > { %527 = vst [vmem:[%s909_s29 + $0x78] sm:$0xff] %v511_v1 }
 0x11b PF: > { %s13_s18 = sadd.s32 1, %s795_s18   ;;  %s991_s12 = smov %s775_s13 }
 0x11c   : > { %p10_p0 = scmp.ge.s32.totalorder %s13_s18, 6   ;;  %s992_s13 = smov %s869_s25 }
 0x11d   : > { %s993_s14 = smov %s787_s16  ;;  %s994_s15 = smov %s791_s17 }
 0x11e   : > { %s995_s16 = smov %s998_s19  ;;  %s996_s17 = smov %s1002_s20 }
 0x11f   :  { %12 = sbr.rel (!%p10_p0) target bundleno = 4 (0x4), region = 116 }

</bundles_post_ra>
